<compile_context>
chip_gen: v5e
topology: v5e:2x2
jax: 0.10.0
libtpu: 0.0.40
codegen_flags: <defaults>
</compile_context>

<pallas_src>
import functools

import jax
import jax.numpy as jnp
from jax import lax
from jax.experimental import pallas as pl
from jax.experimental.pallas import tpu as pltpu


_ONEHOT_MAX_V = 4096                 # above this the (T, V) one-hot stops being free
_DEFAULT_TOKENS_PER_BLOCK = 256      # amortizes ~0.35 us/grid-step overhead


# --------------------------------------------------------------------------
# Kernels
# --------------------------------------------------------------------------
def _onehot_gather_kernel(ids_ref, table_ref, out_ref, *, vocab_size):
    """MXU gather: out = onehot(ids) @ table for one (T, D) output block.

    ids_ref   : VMEM (T, 1) int32 token ids for this block
    table_ref : VMEM (V, D) embedding table, resident across the whole grid
    out_ref   : VMEM (T, D) output block
    """
    ids = ids_ref[...]                                           # (T, 1) int32
    t = ids.shape[0]
    iota = lax.broadcasted_iota(jnp.int32, (t, vocab_size), 1)   # (T, V)
    onehot = (ids == iota).astype(table_ref.dtype)               # exact 0/1
    out_ref[...] = jnp.dot(
        onehot, table_ref[...], preferred_element_type=jnp.float32
    ).astype(out_ref.dtype)


def _rowcopy_gather_kernel(ids_ref, table_ref, out_ref, stage_ref, *,
                           tokens_per_block):
    """Fallback for large V: per-row VMEM copy, stores batched 8 rows at a time.

    ids_ref   : SMEM scalar-prefetch ref, (n_tokens_padded,) int32
    table_ref : VMEM (V, D) embedding table, resident across the whole grid
    out_ref   : VMEM (T, D) output block
    stage_ref : VMEM (8, D) staging scratch (turns 1-sublane masked stores
                into unmasked (8, D) tile stores)
    """
    base = pl.program_id(0) * tokens_per_block
    num_groups = tokens_per_block // 8

    def group_body(g, carry):
        g8 = pl.multiple_of(g * 8, 8)

        def row_body(t, c):
            row = ids_ref[base + g8 + t]                  # scalar read (SMEM)
            stage_ref[pl.ds(t, 1), :] = table_ref[pl.ds(row, 1), :]
            return c

        lax.fori_loop(0, 8, row_body, 0, unroll=True)
        out_ref[pl.ds(g8, 8), :] = stage_ref[...]         # unmasked (8, D) store
        return carry

    lax.fori_loop(0, num_groups, group_body, 0)


# --------------------------------------------------------------------------
# Wrapper
# --------------------------------------------------------------------------
def _vmem_capacity_bytes():
    """Per-TensorCore VMEM capacity; conservative default if query fails."""
    try:
        cap = getattr(pltpu.get_tpu_info(), "vmem_capacity_bytes", None)
        if cap:
            return int(cap)
    except Exception:
        pass
    return 64 << 20   # v7x per-TC VMEM (smallest across generations)


def embedding_lookup(emb_table, token_ids, *,
                     tokens_per_block=_DEFAULT_TOKENS_PER_BLOCK,
                     force_rowcopy=False):
    """Gather rows of `emb_table` at `token_ids` via a Pallas kernel.

    emb_table: (V, D), token_ids: (N,) int -> (N, D) in emb_table.dtype.
    """
    v, d = emb_table.shape
    n = int(token_ids.shape[0])
    itemsize = jnp.dtype(emb_table.dtype).itemsize

    # Out-of-range ids are clamped to valid rows. NOTE: PyTorch nn.Embedding
    # would raise on an invalid id; we remap silently (documented divergence).
    ids = jnp.clip(token_ids.astype(jnp.int32), 0, v - 1)

    # ---- block / padding geometry ------------------------------------
    n8 = pl.cdiv(n, 8) * 8
    if n8 <= tokens_per_block:
        tokens_per_block = n8          # single block covering the whole array
    n_pad = pl.cdiv(n, tokens_per_block) * tokens_per_block
    num_blocks = n_pad // tokens_per_block
    if n_pad != n:
        ids = jnp.pad(ids, (0, n_pad - n))     # pad ids -> row 0 (sliced off)

    use_onehot = (v <= _ONEHOT_MAX_V) and not force_rowcopy

    # ---- VMEM budget (generation aware) -------------------------------
    table_bytes = v * d * itemsize
    out_block_bytes = tokens_per_block * d * itemsize
    ids_block_bytes = tokens_per_block * 4
    # table single-buffered (constant index_map) + double-buffered io blocks
    approx_vmem = table_bytes + 2 * (out_block_bytes + ids_block_bytes) + (1 << 20)
    if use_onehot:
        approx_vmem += tokens_per_block * v * itemsize   # materialized one-hot
    else:
        approx_vmem += 8 * d * itemsize                  # staging scratch

    vmem_budget = int(0.75 * _vmem_capacity_bytes())     # ~48 MiB v7x, ~96 MiB v5e/v6e
    if approx_vmem > vmem_budget:
        # TODO(synk): chunked manual-DMA row gather (memory_space=pl.ANY table
        # + make_async_copy, prefetch depth 4-8) instead of this XLA fallback.
        return jnp.take(emb_table, ids[:n], axis=0)

    compiler_kwargs = dict(dimension_semantics=("parallel",))
    if approx_vmem > (16 << 20):                         # v5e default scoped limit
        compiler_kwargs["vmem_limit_bytes"] = int(min(approx_vmem, vmem_budget))
    compiler_params = pltpu.CompilerParams(**compiler_kwargs)

    def call(single_buffer_table):
        table_spec_kwargs = (
            dict(pipeline_mode=pl.Buffered(1)) if single_buffer_table else {})
        if use_onehot:
            kernel = functools.partial(_onehot_gather_kernel, vocab_size=v)
            grid_spec = pltpu.PrefetchScalarGridSpec(
                num_scalar_prefetch=0,
                grid=(num_blocks,),
                in_specs=[
                    # (T, 1) ids block per grid step.
                    pl.BlockSpec((tokens_per_block, 1), lambda i: (i, 0)),
                    # Whole table resident in VMEM; constant index_map ->
                    # DMA'd once, reused every grid step.
                    pl.BlockSpec((v, d), lambda i: (0, 0), **table_spec_kwargs),
                ],
                out_specs=pl.BlockSpec((tokens_per_block, d), lambda i: (i, 0)),
            )
            args = (ids.reshape(n_pad, 1), emb_table)
        else:
            kernel = functools.partial(_rowcopy_gather_kernel,
                                       tokens_per_block=tokens_per_block)
            grid_spec = pltpu.PrefetchScalarGridSpec(
                num_scalar_prefetch=1,          # ids land in SMEM before the grid
                grid=(num_blocks,),
                in_specs=[
                    pl.BlockSpec((v, d), lambda i, ids_ref: (0, 0),
                                 **table_spec_kwargs),
                ],
                out_specs=pl.BlockSpec((tokens_per_block, d),
                                       lambda i, ids_ref: (i, 0)),
                scratch_shapes=[pltpu.VMEM((8, d), emb_table.dtype)],
            )
            args = (ids, emb_table)
        return pl.pallas_call(
            kernel,
            out_shape=jax.ShapeDtypeStruct((n_pad, d), emb_table.dtype),
            grid_spec=grid_spec,
            compiler_params=compiler_params,
        )(*args)

    try:
        out = jax.block_until_ready(call(single_buffer_table=True))
    except Exception:
        # pipeline_mode=pl.Buffered(1) not supported by this JAX build;
        # retry with default (double) buffering of the resident table.
        out = call(single_buffer_table=False)

    return out if n_pad == n else out[:n]


# --------------------------------------------------------------------------
# Module port
# --------------------------------------------------------------------------
class Lang:
    def __init__(self, vocab_size):
        self.vocab_size = vocab_size


class Decoder:
    """JAX/Pallas port of the PyTorch Decoder module."""

    def __init__(self, lang, max_seq_len, embedding_dim=100, hidden_size=512,
                 num_layers=2, param_dtype=jnp.float32):
        self.lang = lang
        self.max_seq_len = max_seq_len
        self.hidden_size = hidden_size
        self.num_layers = num_layers
        self.bidirectional = True
        # nn.Embedding default init: N(0, 1). Deterministic in-script init.
        # param_dtype=jnp.bfloat16 halves HBM/VMEM traffic of the gather (no
        # arithmetic is done on the rows); f32 kept as default for parity with
        # the f32 PyTorch reference.
        key = jax.random.PRNGKey(0)
        self.embedding_weight = jax.random.normal(
            key, (lang.vocab_size, embedding_dim)).astype(param_dtype)

    def forward(self, word):
        # TODO(synk): the original PyTorch forward body is `pass` (returns
        # None); we implement the embedding lookup -- the only computation the
        # module defines -- as the Pallas kernel and return its result.
        b, s = word.shape
        flat_ids = word.reshape(-1).astype(jnp.int32)
        emb = embedding_lookup(self.embedding_weight, flat_ids)
        return emb.reshape(b, s, -1)

    def __repr__(self):
        return '<Decoder>'


if __name__ == "__main__":
    # Small, module-consistent shapes (embedding_dim kept lane-dense = 128).
    vocab_size = 64
    embedding_dim = 128
    batch, seq = 2, 8

    lang = Lang(vocab_size)
    decoder = Decoder(lang, max_seq_len=seq, embedding_dim=embedding_dim,
                      hidden_size=32, num_layers=2)

    key = jax.random.PRNGKey(0)
    word = jax.random.randint(key, (batch, seq), 0, vocab_size, dtype=jnp.int32)

    out = decoder.forward(word)
    out = jax.block_until_ready(out)

    # Cross-check against the plain-JAX reference gather.
    ref = jnp.take(decoder.embedding_weight, word.reshape(-1), axis=0)
    ref = ref.reshape(batch, seq, embedding_dim)
    assert out.shape == (batch, seq, embedding_dim), out.shape
    assert jnp.allclose(out, ref), "one-hot matmul gather mismatch"

    # Also exercise the large-vocab row-copy fallback path for correctness.
    flat_ids = word.reshape(-1).astype(jnp.int32)
    out_rc = embedding_lookup(decoder.embedding_weight, flat_ids,
                              force_rowcopy=True)
    out_rc = jax.block_until_ready(out_rc)
    assert jnp.allclose(out_rc, ref.reshape(-1, embedding_dim)), \
        "row-copy gather mismatch"

    print("KERNEL_OK")
</pallas_src>

<mosaic_0001>
module attributes {stable_mosaic.version = 11 : i64} {
  func.func @_onehot_gather_kernel(%arg0: i32, %arg1: memref<16x1xi32, #tpu.memory_space<vmem>>, %arg2: memref<64x128xf32, #tpu.memory_space<vmem>>, %arg3: memref<16x128xf32, #tpu.memory_space<vmem>>) attributes {dimension_semantics = [#tpu.dimension_semantics<parallel>], iteration_bounds = array<i64: 1>, scalar_prefetch = 0 : i64, scratch_operands = 0 : i64, tpu.core_type = #tpu.core_type<tc>, window_params = [{transform_indices = @transform_0, window_bounds = array<i64: 16, 1>}, {pipeline_mode = #tpu.pipeline_mode<synchronous>, transform_indices = @transform_1, window_bounds = array<i64: 64, 128>}, {transform_indices = @transform_2, window_bounds = array<i64: 16, 128>}]} {
    %c0 = arith.constant 0 : index
    %c0_0 = arith.constant 0 : index
    %0 = vector.load %arg1[%c0, %c0_0] : memref<16x1xi32, #tpu.memory_space<vmem>>, vector<16x1xi32>
    %1 = tpu.iota {dimensions = array<i32: 1>} : vector<16x64xi32>
    %2 = vector.broadcast %0 : vector<16x1xi32> to vector<16x64xi32>
    %3 = arith.cmpi eq, %2, %1 : vector<16x64xi32>
    %4 = arith.extui %3 : vector<16x64xi1> to vector<16x64xi32>
    %5 = arith.sitofp %4 : vector<16x64xi32> to vector<16x64xf32>
    %c0_1 = arith.constant 0 : index
    %c0_2 = arith.constant 0 : index
    %6 = vector.load %arg2[%c0_1, %c0_2] : memref<64x128xf32, #tpu.memory_space<vmem>>, vector<64x128xf32>
    %cst = arith.constant dense<0.000000e+00> : vector<16x128xf32>
    %7 = tpu.matmul %5, %6, %cst {dimension_numbers = #tpu.dot_dimension_numbers<[1], [0], [0], [1], [0, 0, 1, 1], [], []>} : vector<16x64xf32>, vector<64x128xf32>, vector<16x128xf32> -> vector<16x128xf32>
    %c0_3 = arith.constant 0 : index
    %c0_4 = arith.constant 0 : index
    %8 = vector.load %arg3[%c0_3, %c0_4] : memref<16x128xf32, #tpu.memory_space<vmem>>, vector<16x128xf32>
    tpu.vector_store %arg3[%c0_3, %c0_4], %7 {strides = array<i32>} : memref<16x128xf32, #tpu.memory_space<vmem>>, vector<16x128xf32>,
    return
  }
  func.func @transform_0(%arg0: i32) -> (i32, i32) {
    %c0_i32 = arith.constant 0 : i32
    %c0_i32_0 = arith.constant 0 : i32
    return %arg0, %c0_i32 : i32, i32
  }
  func.func @transform_1(%arg0: i32) -> (i32, i32) {
    %c0_i32 = arith.constant 0 : i32
    %c0_i32_0 = arith.constant 0 : i32
    %c0_i32_1 = arith.constant 0 : i32
    return %c0_i32, %c0_i32_0 : i32, i32
  }
  func.func @transform_2(%arg0: i32) -> (i32, i32) {
    %c0_i32 = arith.constant 0 : i32
    %c0_i32_0 = arith.constant 0 : i32
    return %arg0, %c0_i32 : i32, i32
  }
}

module attributes {stable_mosaic.version = 11 : i64} {
  func.func @_onehot_gather_kernel(%arg0: i32, %arg1: memref<16x1xi32, #tpu.memory_space<vmem>>, %arg2: memref<64x128xf32, #tpu.memory_space<vmem>>, %arg3: memref<16x128xf32, #tpu.memory_space<vmem>>) attributes {dimension_semantics = [#tpu.dimension_semantics<parallel>], iteration_bounds = array<i64: 1>, scalar_prefetch = 0 : i64, scratch_operands = 0 : i64, tpu.core_type = #tpu.core_type<tc>, window_params = [{transform_indices = @transform_0, window_bounds = array<i64: 16, 1>}, {pipeline_mode = #tpu.pipeline_mode<synchronous>, transform_indices = @transform_1, window_bounds = array<i64: 64, 128>}, {transform_indices = @transform_2, window_bounds = array<i64: 16, 128>}]} {
    %c0 = arith.constant 0 : index
    %c0_0 = arith.constant 0 : index
    %0 = vector.load %arg1[%c0, %c0_0] : memref<16x1xi32, #tpu.memory_space<vmem>>, vector<16x1xi32>
    %1 = tpu.iota {dimensions = array<i32: 1>} : vector<16x64xi32>
    %2 = vector.broadcast %0 : vector<16x1xi32> to vector<16x64xi32>
    %3 = arith.cmpi eq, %2, %1 : vector<16x64xi32>
    %4 = arith.extui %3 : vector<16x64xi1> to vector<16x64xi32>
    %5 = arith.sitofp %4 : vector<16x64xi32> to vector<16x64xf32>
    %c0_1 = arith.constant 0 : index
    %c0_2 = arith.constant 0 : index
    %6 = vector.load %arg2[%c0_1, %c0_2] : memref<64x128xf32, #tpu.memory_space<vmem>>, vector<64x128xf32>
    %cst = arith.constant dense<0.000000e+00> : vector<16x128xf32>
    %7 = tpu.matmul %5, %6, %cst {dimension_numbers = #tpu.dot_dimension_numbers<[1], [0], [0], [1], [0, 0, 1, 1], [], []>} : vector<16x64xf32>, vector<64x128xf32>, vector<16x128xf32> -> vector<16x128xf32>
    %c0_3 = arith.constant 0 : index
    %c0_4 = arith.constant 0 : index
    %8 = vector.load %arg3[%c0_3, %c0_4] : memref<16x128xf32, #tpu.memory_space<vmem>>, vector<16x128xf32>
    tpu.vector_store %arg3[%c0_3, %c0_4], %7 {strides = array<i32>} : memref<16x128xf32, #tpu.memory_space<vmem>>, vector<16x128xf32>,
    return
  }
  func.func @transform_0(%arg0: i32) -> (i32, i32) {
    %c0_i32 = arith.constant 0 : i32
    %c0_i32_0 = arith.constant 0 : i32
    return %arg0, %c0_i32 : i32, i32
  }
  func.func @transform_1(%arg0: i32) -> (i32, i32) {
    %c0_i32 = arith.constant 0 : i32
    %c0_i32_0 = arith.constant 0 : i32
    %c0_i32_1 = arith.constant 0 : i32
    return %c0_i32, %c0_i32_0 : i32, i32
  }
  func.func @transform_2(%arg0: i32) -> (i32, i32) {
    %c0_i32 = arith.constant 0 : i32
    %c0_i32_0 = arith.constant 0 : i32
    return %arg0, %c0_i32 : i32, i32
  }
}

</mosaic_0001>

<bundles_post_ra>
// kernel: tpu_custom_call.1
= control target key start
LH: loop header
LB: loop body
LE: loop exit
PB: predicated region body
PF: predicated region fallthrough
CT: control target
= control target key end

     0   :  { %7 = vsyncpa [#allocation3], 0  ;;  %s213_s0 = inlined_call_operand.vmem [shape: s32[16,1], index: 0, kind: input, shape index: {}]   ;;  %s214_s1 = inlined_call_operand.hbm [shape: f32[64,128], index: 1, kind: input, shape index: {}]   ;;  %s215_s2 = inlined_call_operand.hbm [shape: f32[16,128], index: 2, kind: output, shape index: {}]  }
   0x1   :  { %8 = vsyncpa [#allocation4], 0  ;;  %s15_s11 = sshll.u32 %s214_s1, 4  ;;  %s174_s12 = smov [#allocation2]   ;;  %s16_s11 = int_to_ptr.hbm [resolvable:$true] %s15_s11 }
   0x2   :  { %s17_s13 = sshll.u32 %s174_s12, 4  ;;  %s175_s14 = smov 128   ;;  %s18_s13 = int_to_ptr.vmem [resolvable:$true] %s17_s13 }
   0x3   :  { %s176_s15 = smov 8  }
   0x4   :  { %23 = dma.hbm_to_vmem [thread:$0]  %s16_s11, 1024, %s18_s13, [#allocation3], %s175_s14, %s175_s14, %s176_s15  }
   0x5   :  { %170 = dma.done.wait [#allocation3], 1024  }
   0x6   :  { %171 = vsyncadd [#allocation3], 4294966272  ;;  %v177_v0 = vmov 0   ;;  %v28_v1 = vld [vmem:[%s213_s0] sm:$0xff]  ;;  %v51_v2 = vld [vmem:[#allocation2 + $0x38] sm:$0xff]  ;;  %v30_v11 = vlaneseq  ;;  %vm52_vm0 = vcmask 523264  }
   0x7   :  { %121 = vset.pattern.permute.xlu0 %v177_v0  ;;  %67 = vmatpush.msra.mxu0 %v51_v2  ;;  %v50_v3 = vld [vmem:[#allocation2 + $0x30] sm:$0xff]  ;;  %v49_v4 = vld [vmem:[#allocation2 + $0x28] sm:$0xff]  ;;  %v48_v5 = vld [vmem:[#allocation2 + $0x20] sm:$0xff]  ;;  %v178_v14 = vmov 0.0   ;;  %s90_s22 = sshll.u32 %s215_s2, 4  ;;  %s91_s22 = int_to_ptr.hbm [resolvable:$true] %s90_s22 }
   0x8   :  { %33 = vperm.xlu0 %121, %v28_v1   ;;  %107 = vmatpush.msra.mxu1 %v51_v2  ;;  %v29_v6 = vld [vmem:[%s213_s0 + $0x8] sm:$0xff]  ;;  %v47_v7 = vld [vmem:[#allocation2 + $0x18] sm:$0xff]  ;;  %v46_v8 = vld [vmem:[#allocation2 + $0x10] sm:$0xff]  ;;  %v31_v12 = vand.u32 127, %v30_v11  ;;  %s179_s0 = smov [#allocation5]  }
   0x9   :  { %68 = vmatpush.msra.mxu0 %v50_v3  ;;  %v45_v9 = vld [vmem:[#allocation2 + $0x8] sm:$0xff]  ;;  %v44_v10 = vld [vmem:[#allocation2] sm:$0xff]  ;;  %s88_s19 = sshll.u32 %s179_s0, 4  ;;  %s89_s19 = int_to_ptr.vmem [resolvable:$true] %s88_s19 }
   0xa   :  { %108 = vmatpush.msra.mxu1 %v50_v3 }
   0xb   :  { %69 = vmatpush.msra.mxu0 %v49_v4 }
   0xc   :  { %109 = vmatpush.msra.mxu1 %v49_v4 }
   0xd   :  { %70 = vmatpush.msra.mxu0 %v48_v5 }
   0xe   :  { %110 = vmatpush.msra.mxu1 %v48_v5 }
   0xf   :  { %71 = vmatpush.msra.mxu0 %v47_v7 }
  0x10   :  { %36 = vperm.xlu0 %121, %v29_v6   ;;  %111 = vmatpush.msra.mxu1 %v47_v7 }
  0x11   :  { %72 = vmatpush.msra.mxu0 %v46_v8 }
  0x12   :  { %112 = vmatpush.msra.mxu1 %v46_v8 }
  0x13   :  { %73 = vmatpush.msra.mxu0 %v45_v9 }
  0x14   :  { %113 = vmatpush.msra.mxu1 %v45_v9 }
  0x15   :  { %74 = vmatpush.msra.mxu0 %v44_v10 }
  0x16   :  { %114 = vmatpush.msra.mxu1 %v44_v10 }
  0x7a   :  { %v34_v13 = vpop.permute.xlu0 %33 }
  0x7b   :  { %vm38_vm1 = vcmp.eq.s32.totalorder %v34_v13, %v31_v12 }
  0x7c   :  { %v103_v15 = vsel %vm38_vm1, 1.0, %v178_v14 }
  0x7d   :  { %105 = vmatmul.msk.f32.vlgmr.msra.gmra.mxu0 %vm52_vm0, %v103_v15 }
  0x82   :  { %v37_v16 = vpop.permute.xlu0 %36 }
  0x83   :  { %vm39_vm2 = vcmp.eq.s32.totalorder %v37_v16, %v31_v12 }
  0x84   :  { %v104_v17 = vsel %vm39_vm2, 1.0, %v178_v14 }
  0x85   :  { %106 = vmatmul.msk.f32.vlgmr.msra.gmra.mxu1 %vm52_vm0, %v104_v17 }
  0xfa   :  { %v76_v18 = vpop.f32.mrf.mxu0 }
  0xfb   :  { %82 = vst [vmem:[#allocation5] sm:$0xff] %v76_v18 }
 0x102   :  { %v79_v19 = vpop.f32.mrf.mxu1 }
 0x103   :  { %83 = vst [vmem:[#allocation5 + $0x8] sm:$0xff] %v79_v19 }
 0x104   :  { %96 = dma.vmem_to_hbm [thread:$0]  %s89_s19, 256, %s91_s22, [#allocation4], %s175_s14, %s175_s14, %s176_s15  }
 0x105   :  { %172 = dma.done.wait [#allocation4], 256  }
 0x106   :  { %173 = vsyncadd [#allocation4], 4294967040 }
 0x107   :  { %101 = vsyncpa [#allocation3], 1 }
 0x108   :  { %102 = vsyncpa [#allocation4], 1 }

// kernel: tpu_custom_call.1
= control target key start
LH: loop header
LB: loop body
LE: loop exit
PB: predicated region body
PF: predicated region fallthrough
CT: control target
= control target key end

     0   :  { %7 = vsyncpa [#allocation3], 0  ;;  %s213_s0 = inlined_call_operand.vmem [shape: s32[16,1], index: 0, kind: input, shape index: {}]   ;;  %s214_s1 = inlined_call_operand.hbm [shape: f32[64,128], index: 1, kind: input, shape index: {}]   ;;  %s215_s2 = inlined_call_operand.hbm [shape: f32[16,128], index: 2, kind: output, shape index: {}]  }
   0x1   :  { %8 = vsyncpa [#allocation4], 0  ;;  %s15_s11 = sshll.u32 %s214_s1, 4  ;;  %s174_s12 = smov [#allocation2]   ;;  %s16_s11 = int_to_ptr.hbm [resolvable:$true] %s15_s11 }
   0x2   :  { %s17_s13 = sshll.u32 %s174_s12, 4  ;;  %s175_s14 = smov 128   ;;  %s18_s13 = int_to_ptr.vmem [resolvable:$true] %s17_s13 }
   0x3   :  { %s176_s15 = smov 8  }
   0x4   :  { %23 = dma.hbm_to_vmem [thread:$0]  %s16_s11, 1024, %s18_s13, [#allocation3], %s175_s14, %s175_s14, %s176_s15  }
   0x5   :  { %170 = dma.done.wait [#allocation3], 1024  }
   0x6   :  { %171 = vsyncadd [#allocation3], 4294966272  ;;  %v177_v0 = vmov 0   ;;  %v28_v1 = vld [vmem:[%s213_s0] sm:$0xff]  ;;  %v51_v2 = vld [vmem:[#allocation2 + $0x38] sm:$0xff]  ;;  %v30_v11 = vlaneseq  ;;  %vm52_vm0 = vcmask 523264  }
   0x7   :  { %121 = vset.pattern.permute.xlu0 %v177_v0  ;;  %67 = vmatpush.msra.mxu0 %v51_v2  ;;  %v50_v3 = vld [vmem:[#allocation2 + $0x30] sm:$0xff]  ;;  %v49_v4 = vld [vmem:[#allocation2 + $0x28] sm:$0xff]  ;;  %v48_v5 = vld [vmem:[#allocation2 + $0x20] sm:$0xff]  ;;  %v178_v14 = vmov 0.0   ;;  %s90_s22 = sshll.u32 %s215_s2, 4  ;;  %s91_s22 = int_to_ptr.hbm [resolvable:$true] %s90_s22 }
   0x8   :  { %33 = vperm.xlu0 %121, %v28_v1   ;;  %107 = vmatpush.msra.mxu1 %v51_v2  ;;  %v29_v6 = vld [vmem:[%s213_s0 + $0x8] sm:$0xff]  ;;  %v47_v7 = vld [vmem:[#allocation2 + $0x18] sm:$0xff]  ;;  %v46_v8 = vld [vmem:[#allocation2 + $0x10] sm:$0xff]  ;;  %v31_v12 = vand.u32 127, %v30_v11  ;;  %s179_s0 = smov [#allocation5]  }
   0x9   :  { %68 = vmatpush.msra.mxu0 %v50_v3  ;;  %v45_v9 = vld [vmem:[#allocation2 + $0x8] sm:$0xff]  ;;  %v44_v10 = vld [vmem:[#allocation2] sm:$0xff]  ;;  %s88_s19 = sshll.u32 %s179_s0, 4  ;;  %s89_s19 = int_to_ptr.vmem [resolvable:$true] %s88_s19 }
   0xa   :  { %108 = vmatpush.msra.mxu1 %v50_v3 }
   0xb   :  { %69 = vmatpush.msra.mxu0 %v49_v4 }
   0xc   :  { %109 = vmatpush.msra.mxu1 %v49_v4 }
   0xd   :  { %70 = vmatpush.msra.mxu0 %v48_v5 }
   0xe   :  { %110 = vmatpush.msra.mxu1 %v48_v5 }
   0xf   :  { %71 = vmatpush.msra.mxu0 %v47_v7 }
  0x10   :  { %36 = vperm.xlu0 %121, %v29_v6   ;;  %111 = vmatpush.msra.mxu1 %v47_v7 }
  0x11   :  { %72 = vmatpush.msra.mxu0 %v46_v8 }
  0x12   :  { %112 = vmatpush.msra.mxu1 %v46_v8 }
  0x13   :  { %73 = vmatpush.msra.mxu0 %v45_v9 }
  0x14   :  { %113 = vmatpush.msra.mxu1 %v45_v9 }
  0x15   :  { %74 = vmatpush.msra.mxu0 %v44_v10 }
  0x16   :  { %114 = vmatpush.msra.mxu1 %v44_v10 }
  0x7a   :  { %v34_v13 = vpop.permute.xlu0 %33 }
  0x7b   :  { %vm38_vm1 = vcmp.eq.s32.totalorder %v34_v13, %v31_v12 }
  0x7c   :  { %v103_v15 = vsel %vm38_vm1, 1.0, %v178_v14 }
  0x7d   :  { %105 = vmatmul.msk.f32.vlgmr.msra.gmra.mxu0 %vm52_vm0, %v103_v15 }
  0x82   :  { %v37_v16 = vpop.permute.xlu0 %36 }
  0x83   :  { %vm39_vm2 = vcmp.eq.s32.totalorder %v37_v16, %v31_v12 }
  0x84   :  { %v104_v17 = vsel %vm39_vm2, 1.0, %v178_v14 }
  0x85   :  { %106 = vmatmul.msk.f32.vlgmr.msra.gmra.mxu1 %vm52_vm0, %v104_v17 }
  0xfa   :  { %v76_v18 = vpop.f32.mrf.mxu0 }
  0xfb   :  { %82 = vst [vmem:[#allocation5] sm:$0xff] %v76_v18 }
 0x102   :  { %v79_v19 = vpop.f32.mrf.mxu1 }
 0x103   :  { %83 = vst [vmem:[#allocation5 + $0x8] sm:$0xff] %v79_v19 }
 0x104   :  { %96 = dma.vmem_to_hbm [thread:$0]  %s89_s19, 256, %s91_s22, [#allocation4], %s175_s14, %s175_s14, %s176_s15  }
 0x105   :  { %172 = dma.done.wait [#allocation4], 256  }
 0x106   :  { %173 = vsyncadd [#allocation4], 4294967040 }
 0x107   :  { %101 = vsyncpa [#allocation3], 1 }
 0x108   :  { %102 = vsyncpa [#allocation4], 1 }

</bundles_post_ra>
